<compile_context>
chip_gen: v5e
topology: v5e:2x2
jax: 0.10.0
libtpu: 0.0.40
codegen_flags: <defaults>
</compile_context>

<pallas_src>
import functools

import jax
import jax.numpy as jnp
from jax.experimental import pallas as pl
from jax.experimental.pallas import tpu as pltpu


# Conservative budgets that fit every generation (v7x: 64 MiB VMEM/TC,
# v5e/v6e: 128 MiB).  Tiles beyond ~1-2K rows show no further HBM-roofline
# gain, so a universal budget costs nothing on the bigger-VMEM chips.
_TILE_VMEM_BUDGET = 32 * 1024 * 1024   # working-set budget used for tm choice
_VMEM_LIMIT_BYTES = 48 * 1024 * 1024   # explicit scoped-VMEM limit


def _round_up(x, m):
    return ((x + m - 1) // m) * m


def _pick_tm(M, K, E_pad, in_itemsize, out_itemsize):
    """Pick an M-tile that fits the VMEM budget (double-buffered in/out tiles
    plus the resident weight block) and yields >=2 grid steps when possible."""
    cap = 16
    for cand in (2048, 1024, 512, 256, 128, 64, 32, 16):
        need = (2 * cand * K * in_itemsize          # double-buffered activation tile
                + 2 * cand * E_pad * out_itemsize   # double-buffered output tile
                + 2 * K * E_pad * in_itemsize       # weight block (conservative 2x)
                + 2 * E_pad * 4)                    # bias
        if need <= _TILE_VMEM_BUDGET:
            cap = cand
            break
    tm = min(cap, _round_up(M, 16))
    # Prefer >=2 grid steps so the "parallel" axis can be sharded across the
    # two TensorCores on v7x (and pipelining has something to overlap).
    if M > 16 and pl.cdiv(M, tm) < 2:
        tm = max(16, _round_up(pl.cdiv(M, 2), 16))
    return tm


def _patch_embed_kernel(x_ref, w_ref, b_ref, o_ref):
    # x_ref: (tm, K) bf16 patch rows    w_ref: (K, E_pad) bf16 (VMEM-resident)
    # b_ref: (1, E_pad) f32             o_ref: (tm, E_pad) out dtype
    acc = jnp.dot(x_ref[...], w_ref[...], preferred_element_type=jnp.float32)
    o_ref[...] = (acc + b_ref[...]).astype(o_ref.dtype)


def patch_embed_matmul(x_patches, w_folded, b_folded, *, out_dtype):
    """x_patches: (M, K), w_folded: (K, E_pad), b_folded: (1, E_pad) -> (M, E_pad)."""
    M, K = x_patches.shape
    K2, E_pad = w_folded.shape
    assert K == K2 and E_pad % 128 == 0

    tm = _pick_tm(M, K, E_pad,
                  jnp.dtype(x_patches.dtype).itemsize,
                  jnp.dtype(out_dtype).itemsize)
    grid = (pl.cdiv(M, tm),)

    return pl.pallas_call(
        _patch_embed_kernel,
        out_shape=jax.ShapeDtypeStruct((M, E_pad), out_dtype),
        grid_spec=pltpu.PrefetchScalarGridSpec(
            num_scalar_prefetch=0,
            grid=grid,
            in_specs=[
                pl.BlockSpec((tm, K), lambda i: (i, 0)),       # streamed M tiles
                pl.BlockSpec((K, E_pad), lambda i: (0, 0)),    # weight, resident
                pl.BlockSpec((1, E_pad), lambda i: (0, 0)),    # bias, resident
            ],
            out_specs=pl.BlockSpec((tm, E_pad), lambda i: (i, 0)),
        ),
        compiler_params=pltpu.CompilerParams(
            dimension_semantics=("parallel",),
            vmem_limit_bytes=_VMEM_LIMIT_BYTES,
        ),
    )(x_patches, w_folded, b_folded)


def fold_conv_params(conv_weight, conv_bias, compute_dtype=jnp.bfloat16):
    """One-time transform of PyTorch Conv2d(k=p, stride=p) params into the
    kernel layout.  Do this OUTSIDE the jitted forward (stored parameters):
      conv_weight (E, C, ph, pw) -> (K=C*ph*pw, E_pad) in compute_dtype
      conv_bias   (E,)           -> (1, E_pad) in f32
    E is padded up to a multiple of 128 for lane-dense stores."""
    E, C, ph, pw = conv_weight.shape
    K = C * ph * pw
    E_pad = _round_up(max(E, 128), 128)
    w = conv_weight.reshape(E, K).T.astype(compute_dtype)        # cols (c, kh, kw)
    w = jnp.pad(w, ((0, 0), (0, E_pad - E)))
    b = jnp.pad(conv_bias.astype(jnp.float32), (0, E_pad - E)).reshape(1, E_pad)
    return w, b


def patch_embed_forward(x, w_folded, b_folded, *, patch_size, embed_dim):
    """PatchEmbed.forward.

    x:        (B, C, H, W) NCHW, matching PyTorch.
    w_folded: (C*ph*pw, E_pad)  from fold_conv_params
    b_folded: (1, E_pad)        from fold_conv_params
    returns:  (B, num_patches, embed_dim), dtype of x.
    """
    if isinstance(patch_size, (tuple, list)):
        ph, pw = patch_size
    else:
        ph = pw = patch_size
    B, C, H, W = x.shape
    assert H % ph == 0 and W % pw == 0
    gh, gw = H // ph, W // pw
    num_patches = gh * gw
    K = C * ph * pw
    assert w_folded.shape[0] == K

    # Non-overlapping patch extraction: (B,C,gh,ph,gw,pw) -> (B,gh,gw,C,ph,pw).
    # The astype() is fused by XLA into the same copy, so the materialized
    # intermediate is already in the (bf16) compute dtype.
    xp = x.reshape(B, C, gh, ph, gw, pw)
    xp = jnp.transpose(xp, (0, 2, 4, 1, 3, 5))
    x_patches = xp.reshape(B * num_patches, K).astype(w_folded.dtype)

    out = patch_embed_matmul(x_patches, w_folded, b_folded, out_dtype=x.dtype)
    return out[:, :embed_dim].reshape(B, num_patches, embed_dim)


if __name__ == "__main__":
    # Small shapes consistent with the module: img 16x16, patch 4, C=4, E=32, B=2.
    B, C, H, W = 2, 4, 16, 16
    patch_size = 4
    embed_dim = 32

    key = jax.random.PRNGKey(0)
    kx, kw, kb = jax.random.split(key, 3)

    x = jax.random.normal(kx, (B, C, H, W), dtype=jnp.float32)
    fan_in = C * patch_size * patch_size
    bound = 1.0 / (fan_in ** 0.5)
    conv_weight = jax.random.uniform(
        kw, (embed_dim, C, patch_size, patch_size), dtype=jnp.float32,
        minval=-bound, maxval=bound)
    conv_bias = jax.random.uniform(
        kb, (embed_dim,), dtype=jnp.float32, minval=-bound, maxval=bound)

    # One-time parameter fold (outside jit).
    w2d, b2d = fold_conv_params(conv_weight, conv_bias)

    fwd = jax.jit(functools.partial(
        patch_embed_forward, patch_size=patch_size, embed_dim=embed_dim))
    out = fwd(x, w2d, b2d)
    jax.block_until_ready(out)

    # Reference: same conv-as-matmul math with bf16-rounded inputs, f32 accum.
    gh, gw = H // patch_size, W // patch_size
    xp = x.reshape(B, C, gh, patch_size, gw, patch_size)
    xp = jnp.transpose(xp, (0, 2, 4, 1, 3, 5)).reshape(B * gh * gw, -1)
    xp_bf = xp.astype(jnp.bfloat16).astype(jnp.float32)
    w_bf = conv_weight.reshape(embed_dim, -1).T.astype(jnp.bfloat16).astype(jnp.float32)
    ref = (xp_bf @ w_bf + conv_bias).reshape(B, gh * gw, embed_dim)

    assert out.shape == (B, gh * gw, embed_dim)
    assert out.dtype == x.dtype
    assert jnp.allclose(out, ref, atol=2e-3, rtol=2e-3)

    print("KERNEL_OK")
</pallas_src>

<mosaic_0001>
module attributes {stable_mosaic.version = 11 : i64} {
  func.func @_patch_embed_kernel(%arg0: i32, %arg1: memref<16x64xbf16, #tpu.memory_space<vmem>>, %arg2: memref<64x128xbf16, #tpu.memory_space<vmem>>, %arg3: memref<1x128xf32, #tpu.memory_space<vmem>>, %arg4: memref<16x128xf32, #tpu.memory_space<vmem>>) attributes {dimension_semantics = [#tpu.dimension_semantics<parallel>], iteration_bounds = array<i64: 2>, scalar_prefetch = 0 : i64, scratch_operands = 0 : i64, tpu.core_type = #tpu.core_type<tc>, window_params = [{transform_indices = @transform_0, window_bounds = array<i64: 16, 64>}, {pipeline_mode = #tpu.pipeline_mode<synchronous>, transform_indices = @transform_1, window_bounds = array<i64: 64, 128>}, {pipeline_mode = #tpu.pipeline_mode<synchronous>, transform_indices = @transform_2, window_bounds = array<i64: 1, 128>}, {transform_indices = @transform_3, window_bounds = array<i64: 16, 128>}]} {
    %c0 = arith.constant 0 : index
    %c0_0 = arith.constant 0 : index
    %0 = vector.load %arg1[%c0, %c0_0] : memref<16x64xbf16, #tpu.memory_space<vmem>>, vector<16x64xbf16>
    %c0_1 = arith.constant 0 : index
    %c0_2 = arith.constant 0 : index
    %1 = vector.load %arg2[%c0_1, %c0_2] : memref<64x128xbf16, #tpu.memory_space<vmem>>, vector<64x128xbf16>
    %cst = arith.constant dense<0.000000e+00> : vector<16x128xf32>
    %2 = tpu.matmul %0, %1, %cst {dimension_numbers = #tpu.dot_dimension_numbers<[1], [0], [0], [1], [0, 0, 1, 1], [], []>} : vector<16x64xbf16>, vector<64x128xbf16>, vector<16x128xf32> -> vector<16x128xf32>
    %c0_3 = arith.constant 0 : index
    %c0_4 = arith.constant 0 : index
    %3 = vector.load %arg3[%c0_3, %c0_4] : memref<1x128xf32, #tpu.memory_space<vmem>>, vector<1x128xf32>
    %4 = vector.broadcast %3 : vector<1x128xf32> to vector<16x128xf32>
    %5 = arith.addf %2, %4 : vector<16x128xf32>
    %c0_5 = arith.constant 0 : index
    %c0_6 = arith.constant 0 : index
    %6 = vector.load %arg4[%c0_5, %c0_6] : memref<16x128xf32, #tpu.memory_space<vmem>>, vector<16x128xf32>
    tpu.vector_store %arg4[%c0_5, %c0_6], %5 {strides = array<i32>} : memref<16x128xf32, #tpu.memory_space<vmem>>, vector<16x128xf32>,
    return
  }
  func.func @transform_0(%arg0: i32) -> (i32, i32) {
    %c0_i32 = arith.constant 0 : i32
    %c0_i32_0 = arith.constant 0 : i32
    return %arg0, %c0_i32 : i32, i32
  }
  func.func @transform_1(%arg0: i32) -> (i32, i32) {
    %c0_i32 = arith.constant 0 : i32
    %c0_i32_0 = arith.constant 0 : i32
    %c0_i32_1 = arith.constant 0 : i32
    return %c0_i32, %c0_i32_0 : i32, i32
  }
  func.func @transform_2(%arg0: i32) -> (i32, i32) {
    %c0_i32 = arith.constant 0 : i32
    %c0_i32_0 = arith.constant 0 : i32
    %c0_i32_1 = arith.constant 0 : i32
    return %c0_i32, %c0_i32_0 : i32, i32
  }
  func.func @transform_3(%arg0: i32) -> (i32, i32) {
    %c0_i32 = arith.constant 0 : i32
    %c0_i32_0 = arith.constant 0 : i32
    return %arg0, %c0_i32 : i32, i32
  }
}

</mosaic_0001>

<bundles_post_ra>
// kernel: patch_embed_forward.1
= control target key start
LH: loop header
LB: loop body
LE: loop exit
PB: predicated region body
PF: predicated region fallthrough
CT: control target
= control target key end

     0   :  { %8 = vsyncpa [#allocation3], 0  ;;  %s580_s0 = inlined_call_operand.vmem [shape: bf16[32,64], index: 0, kind: input, shape index: {}]   ;;  %s581_s1 = inlined_call_operand.vmem [shape: bf16[64,128], index: 1, kind: input, shape index: {}]   ;;  %s582_s2 = inlined_call_operand.vmem [shape: f32[1,128], index: 2, kind: input, shape index: {}]   ;;  %s583_s3 = inlined_call_operand.hbm [shape: f32[32,128], index: 3, kind: output, shape index: {}]  }
   0x1   :  { %10 = vsyncpa [#allocation3 + $0x1], 0  ;;  %s481_s12 = smov 0   ;;  %s483_s13 = smov 0  }
   0x2   :  { %s485_s14 = smov 0   ;;  %s487_s15 = smov 0  }
   0x3 LB: > { %s502_s16 = sadd.s32 4294967295, %s457_s15   ;;  %s314_s17 = sadd.s32 4294967294, %s457_s15   ;;  %s457_s15 = sphi %s487_s15, %s589_s15   ;;  %s453_s14 = sphi %s485_s14, %s588_s14   ;;  %s449_s13 = sphi %s483_s13, %s587_s13   ;;  %s445_s12 = sphi %s481_s12, %s586_s12  }
   0x4   : > { %s506_s18 = sadd.s32 1, %s457_s15   ;;  %s91_s19 = sadd.s32 1, %s453_s14 }
   0x5   : > { %s88_s20 = ssub.s32 %s457_s15, %s506_s18  ;;  %p101_p0 = scmp.ne.s32.totalorder %s453_s14, %s449_s13 }
   0x6   : > { %p89_p1 = scmp.eq.s32.totalorder %s88_s20, 0  ;;  %p102_p2 = scmp.eq.s32.totalorder %s502_s16, 1 }
   0x7   : > { %p107_p3 = scmp.ne.s32.totalorder %s449_s13, %s445_s12  ;;  %p108_p4 = scmp.eq.s32.totalorder %s314_s17, 1 }
   0x8   : > { %s517_s21 = scalar_select %p89_p1, %s453_s14, %s91_s19  }
   0x9   : > { %p519_p5 = por %p102_p2, %p101_p0  ;;  %p523_p6 = por %p108_p4, %p107_p3 }
   0xa   : > { %p317_p7 = scmp.ge.s32.totalorder %s457_s15, 1  ;;  %p141_p8 = scmp.lt.s32.totalorder %s457_s15, 3 }
   0xc   : > { %p142_p9 = pnand %p317_p7, %p141_p8 }
   0xd   : > { %s319_s26 = sshll.u32 (!%p142_p9), %s502_s16, 1  ;;  %s162_s10 = sand.u32 (!%p142_p9), 1, %s449_s13  }
   0xe   : > { %145 = sbr.rel (%p142_p9) target bundleno = 175 (0xaf), region = 32  ;;  %p166_p10 = scmp.lt.s32.totalorder (!%p142_p9), %s319_s26, 3 }
   0xf   : > { %s318_s11 = sshll.u32 (!%p142_p9), %s162_s10, 4  ;;  %s352_s20 = sshll.u32 (!%p142_p9), %s502_s16, 4 }
  0x10   : > { %s164_s27 = scalar_lea.vmem (!%p142_p9), [#allocation2], %s318_s11  ;;  %s237_s30 = scalar_lea.sflag (!%p142_p9), [#allocation3], %s162_s10 }
  0x11   : > { %s249_s28 = sshll.u32 (!%p142_p9), %s164_s27, 4  ;;  %s415_s7 = scalar_lea.hbm (!%p142_p9), %s583_s3, 32  ;;  %s250_s28 = int_to_ptr.vmem [resolvable:$true] %s249_s28 }
  0x13   : > { %v351_v0 = vld [vmem:[%s581_s1 + $0x18] sm:$0xff]  ;;  %v350_v1 = vld [vmem:[%s581_s1 + $0x10] sm:$0xff]  ;;  %s591_s26 = smov (!%p166_p10, %s319_s26), 3  ;;  %v349_v2 = vld [vmem:[%s581_s1 + $0x8] sm:$0xff]  ;;  %vm216_vm0 = vcmask 523264  }
  0x14   : > { %224 = vmatpush.bf16.msra.mxu0 %v351_v0  ;;  %s320_s4 = sshll.u32 %s591_s26, 2  ;;  %v348_v3 = vld [vmem:[%s581_s1] sm:$0xff]  ;;  %s248_s26 = scalar_lea.hbm %s583_s3, %s352_s20 }
  0x15   : > { %s169_s9 = scalar_lea.vmem %s580_s0, %s320_s4  ;;  %v394_v5 = vld [vmem:[%s582_s2] ss:$0 sm:$0xff]  ;;  %s251_s29 = sshll.u32 %s248_s26, 4  ;;  %s252_s29 = int_to_ptr.hbm [resolvable:$true] %s251_s29 }
  0x16   : > { %v347_v4 = vld [vmem:[%s169_s9] sm:$0xff]  ;;  %s409_s4 = sshra.s32 %s252_s29, 4  ;;  %s410_s4 = int_to_ptr.hbm [resolvable:$true] %s409_s4 }
  0x17   : > { %s411_s16 = scalar_lea.hbm %s410_s4, 16  ;;  %p416_p0 = scmp.lt.s32.totalorder %s410_s4, %s583_s3 }
  0x18   : > { %225 = vmatpush.bf16.msra.mxu0 %v350_v1  ;;  %p412_p11 = scmp.ne.s32.totalorder %s410_s4, %s411_s16  ;;  %p417_p1 = scmp.lt.s32.totalorder %s415_s7, %s411_s16 }
  0x1a   : > { %p413_p12 = pnand %p412_p11, %p519_p5  ;;  %p418_p2 = por %p417_p1, %p416_p0 }
  0x1c   : > { %226 = vmatpush.bf16.msra.mxu0 %v349_v2  ;;  %p414_p13 = pneg %p413_p12 }
  0x1e   : > { %p419_p3 = pnand %p418_p2, %p414_p13 }
  0x20   : > { %227 = vmatpush.bf16.msra.mxu0 %v348_v3 }
  0x23   : > { %341 = vmatmul.msk.bf16.vlgmr.msra.gmra.mxu0 %vm216_vm0, %v347_v4 }
  0xa0   : > { %v229_v6 = vpop.f32.mrf.mxu0 }
  0xa1   : > { %v230_v7 = vadd.f32 %v394_v5, %v229_v6 }
  0xa3   : > { %234 = vst [vmem:[%s164_s27] sm:$0xff] %v230_v7 }
  0xa8   : > { %v231_v8 = vpop.f32.mrf.mxu0 }
  0xa9   : > { %v232_v9 = vadd.f32 %v394_v5, %v231_v8 }
  0xab   : > { %235 = vst [vmem:[%s164_s27 + $0x8] sm:$0xff] %v232_v9 }
  0xac   : > { %422 = shalt.err (!%p419_p3)
}
  0xad   : > { %s459_s10 = smov 128   ;;  %s460_s11 = smov 8  }
  0xae   : > { %353 = dma.vmem_to_hbm [thread:$0]  (%p519_p5), %s250_s28, 256, %s252_s29, %s237_s30, %s459_s10, %s459_s10, %s460_s11  }
  0xaf PF: > { %p359_p4 = scmp.ge.s32.totalorder %s457_s15, 2  ;;  %s266_s17 = sand.u32 1, %s445_s12  }
  0xb0   : > { %s267_s19 = scalar_lea.sflag [#allocation3], %s266_s17 }
  0xb1   : > { %p356_p7 = pnand %p359_p4, %p523_p6 }
  0xb3   : > { %p357_p8 = pneg %p356_p7 }
  0xb5   : > { %440 = dma.done.wait (%p357_p8), %s267_s19, 256  }
  0xb6   : > { %442 = vsyncadd (%p357_p8), %s267_s19, 4294967040  ;;  %p13_p9 = scmp.ge.s32.totalorder %s506_s18, 4   ;;  %s586_s12 = smov %s449_s13 }
  0xb7   : > { %s587_s13 = smov %s453_s14  ;;  %s588_s14 = smov %s517_s21 }
  0xb8   : > { %s589_s15 = smov %s506_s18  ;;  %15 = sbr.rel (!%p13_p9) target bundleno = 3 (0x3), region = 67 }
  0xbd   :  { %273 = vsyncpa [#allocation3], 1 }
  0xbe   :  { %275 = vsyncpa [#allocation3 + $0x1], 1 }

</bundles_post_ra>
